<compile_context>
chip_gen: v6e
topology: v6e:2x2x1
jax: 0.10.0
libtpu: 0.0.40
codegen_flags: <defaults>
</compile_context>

<pallas_src>
import functools
import math

import jax
import jax.numpy as jnp
from jax.experimental import pallas as pl
from jax.experimental.pallas import tpu as pltpu


def _post_linear(h_lin, gamma, beta, add_mask, n_true):
    """L2-normalize -> ReLU -> BatchNorm1d (training stats) -> masked softmax.

    h_lin: [B, tn, Cp] f32 linear output; padded lanes are exactly zero.
    gamma/beta: [1, tn, 1];  add_mask: [1, 1, Cp] (0 real lanes / -1e30 pad).
    """
    B = h_lin.shape[0]

    # F.normalize(dim=-1, p=2) with PyTorch's clamp_min(1e-12) on the norm.
    # rsqrt(max(ssq, 1e-24)) == 1 / max(||h||, 1e-12).
    ssq = jnp.sum(h_lin * h_lin, axis=-1, keepdims=True)
    hk = h_lin * jax.lax.rsqrt(jnp.maximum(ssq, 1e-24))

    # ReLU
    hk = jnp.maximum(hk, 0.0)

    # BatchNorm1d(N), training-mode stats: per node over (batch, class).
    # Zero-padded lanes contribute nothing to the sums; divide by the true
    # element count B * n_true.  gamma/beta folded into one scale/shift.
    inv_cnt = 1.0 / (B * n_true)
    s1 = jnp.sum(jnp.sum(hk, axis=2, keepdims=True), axis=0, keepdims=True)       # [1,tn,1]
    s2 = jnp.sum(jnp.sum(hk * hk, axis=2, keepdims=True), axis=0, keepdims=True)  # [1,tn,1]
    mean = s1 * inv_cnt
    var = jnp.maximum(s2 * inv_cnt - mean * mean, 0.0)
    scale = gamma * jax.lax.rsqrt(var + 1e-5)
    shift = beta - mean * scale
    hk = hk * scale + shift

    # Masked softmax over the true class lanes (additive pad mask).
    hk = hk + add_mask
    m = jnp.max(hk, axis=-1, keepdims=True)
    e = jnp.exp(hk - m)
    return e / jnp.sum(e, axis=-1, keepdims=True)   # exact divide: rows sum to 1


def _assign_kernel_fused(x_ref, adj_ref, w_ref, b_ref, gamma_ref, beta_ref,
                         mask_ref, out_ref, *, n_true):
    """Path for F <= 128: aggregate first, then the (small) linear layer."""
    adj = adj_ref[...].astype(jnp.float32)      # bf16 0/1 -> f32 (exact)
    x = x_ref[...]                              # [B, N, F] f32, grid-resident
    B, tn, _ = adj.shape
    F = x.shape[-1]
    Cp = w_ref.shape[-1]

    # Neighbor aggregation for this row tile (f32 MXU accumulate).
    h = jnp.einsum('bij,bjf->bif', adj, x, preferred_element_type=jnp.float32)

    # Linear layer as ONE flattened matmul (weights shared across batch).
    hk = jnp.dot(h.reshape(B * tn, F), w_ref[...],
                 preferred_element_type=jnp.float32).reshape(B, tn, Cp)
    hk = hk + b_ref[...]

    out_ref[...] = _post_linear(hk, gamma_ref[...], beta_ref[...],
                                mask_ref[...], n_true)


def _assign_kernel_preproj(xw_ref, adj_ref, b_ref, gamma_ref, beta_ref,
                           mask_ref, out_ref, *, n_true):
    """Path for F > 128: x @ W precomputed in the wrapper; aggregate directly."""
    adj = adj_ref[...].astype(jnp.float32)      # bf16 0/1 -> f32 (exact)
    xw = xw_ref[...]                            # [B, N, Cp] f32, grid-resident
    h = jnp.einsum('bij,bjc->bic', adj, xw, preferred_element_type=jnp.float32)
    hk = h + b_ref[...]
    out_ref[...] = _post_linear(hk, gamma_ref[...], beta_ref[...],
                                mask_ref[...], n_true)


def _pick_row_tile(B, N, feat, Cp, adj_itemsize, budget_bytes):
    """Largest row tile tn (N itself, or a multiple-of-32 divisor of N) whose
    working set fits the VMEM budget.  adj/out tiles are double-buffered by
    the Pallas pipeline; the grid-invariant x operand is counted twice to stay
    conservative about buffering."""
    cands = sorted({N} | {t for t in range(32, N, 32) if N % t == 0}, reverse=True)
    fixed = 2 * B * N * feat * 4               # resident x (or x@W)
    fixed += 2 * (feat * Cp + 4 * Cp) * 4      # weight + bias + mask
    for t in cands:
        per_tile = (2 * B * t * N * adj_itemsize   # adj row tile, double-buffered
                    + 2 * B * t * Cp * 4           # output tile, double-buffered
                    + B * t * feat * 4             # aggregated h
                    + 4 * B * t * Cp * 4           # post-linear temporaries
                    + 4 * t * 4 * 2)               # gamma/beta tiles
        if fixed + per_tile <= budget_bytes:
            return t
    return cands[-1]


def diffpool_assignment(x, adj, w, b, gamma, beta, *,
                        vmem_limit_bytes=48 * 1024 * 1024):
    """x: [B,N,F]; adj: [B,N,N]; w: [F,C] (nn.Linear weight, transposed);
    b: [1,1,C]; gamma/beta: [1,N,1] (BatchNorm1d(N) affine).  Returns s_l: [B,N,C]."""
    B, N, F = x.shape
    C = w.shape[1]
    Cp = pl.cdiv(C, 128) * 128               # lane-dense padded class dim

    x = x.astype(jnp.float32)
    gamma = gamma.astype(jnp.float32)
    beta = beta.astype(jnp.float32)

    # Zero-pad weight / bias along the class (lane) dim; additive softmax mask.
    w_p = jnp.zeros((F, Cp), jnp.float32).at[:, :C].set(w.astype(jnp.float32))
    b_p = jnp.zeros((1, 1, Cp), jnp.float32).at[:, :, :C].set(b.astype(jnp.float32))
    mask_p = jnp.where(jnp.arange(Cp) < C, 0.0, -1e30).astype(jnp.float32)
    mask_p = mask_p.reshape(1, 1, Cp)

    # adj is the O(B*N^2) HBM stream; bf16 is exact for 0/1 adjacency.
    adj_bf16 = adj.astype(jnp.bfloat16)

    # Reassociate (adj @ x) @ W == adj @ (x @ W) when it shrinks the problem.
    pre_project = F > Cp
    if pre_project:
        x_in = jnp.einsum('bnf,fc->bnc', x, w_p)   # [B, N, Cp]
        feat = Cp
    else:
        x_in = x
        feat = F

    tn = _pick_row_tile(B, N, feat, Cp, adj_itemsize=2,
                        budget_bytes=int(vmem_limit_bytes * 0.85))
    grid = (N // tn,)

    x_spec = pl.BlockSpec((B, N, feat), lambda i: (0, 0, 0))    # grid-resident
    adj_spec = pl.BlockSpec((B, tn, N), lambda i: (0, i, 0))    # row-tiled, pipelined
    b_spec = pl.BlockSpec((1, 1, Cp), lambda i: (0, 0, 0))
    gb_spec = pl.BlockSpec((1, tn, 1), lambda i: (0, i, 0))
    mask_spec = pl.BlockSpec((1, 1, Cp), lambda i: (0, 0, 0))
    out_spec = pl.BlockSpec((B, tn, Cp), lambda i: (0, i, 0))

    if pre_project:
        kernel = functools.partial(_assign_kernel_preproj, n_true=C)
        in_specs = [x_spec, adj_spec, b_spec, gb_spec, gb_spec, mask_spec]
        args = (x_in, adj_bf16, b_p, gamma, beta, mask_p)
    else:
        kernel = functools.partial(_assign_kernel_fused, n_true=C)
        w_spec = pl.BlockSpec((F, Cp), lambda i: (0, 0))
        in_specs = [x_spec, adj_spec, w_spec, b_spec, gb_spec, gb_spec, mask_spec]
        args = (x_in, adj_bf16, w_p, b_p, gamma, beta, mask_p)

    out_padded = pl.pallas_call(
        kernel,
        out_shape=jax.ShapeDtypeStruct((B, N, Cp), jnp.float32),
        grid=grid,
        in_specs=in_specs,
        out_specs=out_spec,
        compiler_params=pltpu.CompilerParams(
            dimension_semantics=("parallel",),   # shards row tiles across TCs (v7x)
            vmem_limit_bytes=vmem_limit_bytes,   # safe on v7x (64 MiB) and v5e/v6e
        ),
    )(*args)

    # Padded lanes carry ~0 probability; downstream DiffPool products could
    # consume the padded tensor directly.  Slice to match the module output.
    return out_padded[:, :, :C]


def diffpool_assignment_ref(x, adj, w, b, gamma, beta):
    """Pure-JAX reference mirroring the PyTorch forward (validation only)."""
    h = jnp.einsum('bij,bjf->bif', adj, x)
    h = jnp.einsum('bnf,fc->bnc', h, w) + b
    norm = jnp.sqrt(jnp.sum(h * h, axis=-1, keepdims=True))
    h = h / jnp.maximum(norm, 1e-12)
    h = jnp.maximum(h, 0.0)
    mean = jnp.mean(h, axis=(0, 2), keepdims=True)
    var = jnp.mean((h - mean) ** 2, axis=(0, 2), keepdims=True)
    h = (h - mean) * jax.lax.rsqrt(var + 1e-5)
    h = h * gamma + beta
    return jax.nn.softmax(h, axis=-1)


if __name__ == "__main__":
    B, N, NFEAT, NNEXT = 2, 16, 32, 8

    key = jax.random.PRNGKey(0)
    kx, kadj, kw, kb = jax.random.split(key, 4)

    x = jax.random.normal(kx, (B, N, NFEAT), dtype=jnp.float32)
    adj = (jax.random.uniform(kadj, (B, N, N)) > 0.5).astype(jnp.float32)
    adj = jnp.maximum(adj, jnp.transpose(adj, (0, 2, 1)))  # symmetric 0/1 adjacency

    # nn.Linear(nfeat, nnext): weight [C,F] xavier_uniform with gain=sqrt(2),
    # bias ~ U(-1/sqrt(fan_in), 1/sqrt(fan_in)).  Stored transposed as [F,C].
    gain = math.sqrt(2.0)
    bound_w = gain * math.sqrt(6.0 / (NFEAT + NNEXT))
    w_pt = jax.random.uniform(kw, (NNEXT, NFEAT), minval=-bound_w, maxval=bound_w,
                              dtype=jnp.float32)
    w = w_pt.T
    bound_b = 1.0 / math.sqrt(NFEAT)
    b = jax.random.uniform(kb, (1, 1, NNEXT), minval=-bound_b, maxval=bound_b,
                           dtype=jnp.float32)

    # BatchNorm1d(N): fresh module -> gamma=1, beta=0, training-mode batch stats.
    gamma = jnp.ones((1, N, 1), dtype=jnp.float32)
    beta = jnp.zeros((1, N, 1), dtype=jnp.float32)

    s_l = diffpool_assignment(x, adj, w, b, gamma, beta)
    jax.block_until_ready(s_l)

    ref = diffpool_assignment_ref(x, adj, w, b, gamma, beta)

    assert s_l.shape == (B, N, NNEXT)
    assert bool(jnp.allclose(jnp.sum(s_l, axis=-1), 1.0, atol=1e-4))
    assert bool(jnp.allclose(s_l, ref, atol=1e-3, rtol=1e-3))
    print("KERNEL_OK")
</pallas_src>

<mosaic_0001>
module attributes {stable_mosaic.version = 11 : i64} {
  func.func @_assign_kernel_fused(%arg0: i32, %arg1: memref<2x16x32xf32, #tpu.memory_space<vmem>>, %arg2: memref<2x16x16xbf16, #tpu.memory_space<vmem>>, %arg3: memref<32x128xf32, #tpu.memory_space<vmem>>, %arg4: memref<1x1x128xf32, #tpu.memory_space<vmem>>, %arg5: memref<1x16x1xf32, #tpu.memory_space<vmem>>, %arg6: memref<1x16x1xf32, #tpu.memory_space<vmem>>, %arg7: memref<1x1x128xf32, #tpu.memory_space<vmem>>, %arg8: memref<2x16x128xf32, #tpu.memory_space<vmem>>) attributes {dimension_semantics = [#tpu.dimension_semantics<parallel>], iteration_bounds = array<i64: 1>, scalar_prefetch = 0 : i64, scratch_operands = 0 : i64, tpu.core_type = #tpu.core_type<tc>, window_params = [{pipeline_mode = #tpu.pipeline_mode<synchronous>, transform_indices = @transform_0, window_bounds = array<i64: 2, 16, 32>}, {transform_indices = @transform_1, window_bounds = array<i64: 2, 16, 16>}, {pipeline_mode = #tpu.pipeline_mode<synchronous>, transform_indices = @transform_2, window_bounds = array<i64: 32, 128>}, {pipeline_mode = #tpu.pipeline_mode<synchronous>, transform_indices = @transform_3, window_bounds = array<i64: 1, 1, 128>}, {transform_indices = @transform_4, window_bounds = array<i64: 1, 16, 1>}, {transform_indices = @transform_5, window_bounds = array<i64: 1, 16, 1>}, {pipeline_mode = #tpu.pipeline_mode<synchronous>, transform_indices = @transform_6, window_bounds = array<i64: 1, 1, 128>}, {transform_indices = @transform_7, window_bounds = array<i64: 2, 16, 128>}]} {
    %c0 = arith.constant 0 : index
    %c0_0 = arith.constant 0 : index
    %c0_1 = arith.constant 0 : index
    %0 = vector.load %arg2[%c0, %c0_0, %c0_1] : memref<2x16x16xbf16, #tpu.memory_space<vmem>>, vector<2x16x16xbf16>
    %1 = arith.extf %0 : vector<2x16x16xbf16> to vector<2x16x16xf32>
    %c0_2 = arith.constant 0 : index
    %c0_3 = arith.constant 0 : index
    %c0_4 = arith.constant 0 : index
    %2 = vector.load %arg1[%c0_2, %c0_3, %c0_4] : memref<2x16x32xf32, #tpu.memory_space<vmem>>, vector<2x16x32xf32>
    "tpu.trace_start"() <{level = 10 : i32, message = "bij,bjf->bif"}> : () -> ()
    %cst = arith.constant dense<0.000000e+00> : vector<2x16x32xf32>
    %3 = tpu.matmul %1, %2, %cst {dimension_numbers = #tpu.dot_dimension_numbers<[2], [1], [1], [2], [0, 0, 0, 1, 1, 2], [0], [0]>} : vector<2x16x16xf32>, vector<2x16x32xf32>, vector<2x16x32xf32> -> vector<2x16x32xf32>
    "tpu.trace_stop"() : () -> ()
    %4 = vector.shape_cast %3 : vector<2x16x32xf32> to vector<32x32xf32>
    %c0_5 = arith.constant 0 : index
    %c0_6 = arith.constant 0 : index
    %5 = vector.load %arg3[%c0_5, %c0_6] : memref<32x128xf32, #tpu.memory_space<vmem>>, vector<32x128xf32>
    %cst_7 = arith.constant dense<0.000000e+00> : vector<32x128xf32>
    %6 = tpu.matmul %4, %5, %cst_7 {dimension_numbers = #tpu.dot_dimension_numbers<[1], [0], [0], [1], [0, 0, 1, 1], [], []>} : vector<32x32xf32>, vector<32x128xf32>, vector<32x128xf32> -> vector<32x128xf32>
    %7 = vector.shape_cast %6 : vector<32x128xf32> to vector<2x16x128xf32>
    %c0_8 = arith.constant 0 : index
    %c0_9 = arith.constant 0 : index
    %c0_10 = arith.constant 0 : index
    %8 = vector.load %arg4[%c0_8, %c0_9, %c0_10] : memref<1x1x128xf32, #tpu.memory_space<vmem>>, vector<1x1x128xf32>
    %9 = vector.broadcast %8 : vector<1x1x128xf32> to vector<2x16x128xf32>
    %10 = arith.addf %7, %9 : vector<2x16x128xf32>
    %c0_11 = arith.constant 0 : index
    %c0_12 = arith.constant 0 : index
    %c0_13 = arith.constant 0 : index
    %11 = vector.load %arg5[%c0_11, %c0_12, %c0_13] : memref<1x16x1xf32, #tpu.memory_space<vmem>>, vector<1x16x1xf32>
    %c0_14 = arith.constant 0 : index
    %c0_15 = arith.constant 0 : index
    %c0_16 = arith.constant 0 : index
    %12 = vector.load %arg6[%c0_14, %c0_15, %c0_16] : memref<1x16x1xf32, #tpu.memory_space<vmem>>, vector<1x16x1xf32>
    %c0_17 = arith.constant 0 : index
    %c0_18 = arith.constant 0 : index
    %c0_19 = arith.constant 0 : index
    %13 = vector.load %arg7[%c0_17, %c0_18, %c0_19] : memref<1x1x128xf32, #tpu.memory_space<vmem>>, vector<1x1x128xf32>
    %14 = arith.mulf %10, %10 : vector<2x16x128xf32>
    %cst_20 = arith.constant dense<0.000000e+00> : vector<2x16xf32>
    %15 = vector.multi_reduction <add>, %14, %cst_20 [2] : vector<2x16x128xf32> to vector<2x16xf32>
    %16 = vector.shape_cast %15 : vector<2x16xf32> to vector<2x16x1xf32>
    %cst_21 = arith.constant 1.000000e-24 : f32
    %17 = vector.broadcast %cst_21 : f32 to vector<2x16x1xf32>
    %18 = arith.maximumf %16, %17 : vector<2x16x1xf32>
    %19 = math.rsqrt %18 : vector<2x16x1xf32>
    %20 = vector.broadcast %19 : vector<2x16x1xf32> to vector<2x16x128xf32>
    %21 = arith.mulf %10, %20 : vector<2x16x128xf32>
    %cst_22 = arith.constant 0.000000e+00 : f32
    %22 = vector.broadcast %cst_22 : f32 to vector<2x16x128xf32>
    %23 = arith.maximumf %21, %22 : vector<2x16x128xf32>
    %cst_23 = arith.constant dense<0.000000e+00> : vector<2x16xf32>
    %24 = vector.multi_reduction <add>, %23, %cst_23 [2] : vector<2x16x128xf32> to vector<2x16xf32>
    %25 = vector.shape_cast %24 : vector<2x16xf32> to vector<2x16x1xf32>
    %cst_24 = arith.constant dense<0.000000e+00> : vector<16x1xf32>
    %26 = vector.multi_reduction <add>, %25, %cst_24 [0] : vector<2x16x1xf32> to vector<16x1xf32>
    %27 = vector.shape_cast %26 : vector<16x1xf32> to vector<1x16x1xf32>
    %28 = arith.mulf %23, %23 : vector<2x16x128xf32>
    %cst_25 = arith.constant dense<0.000000e+00> : vector<2x16xf32>
    %29 = vector.multi_reduction <add>, %28, %cst_25 [2] : vector<2x16x128xf32> to vector<2x16xf32>
    %30 = vector.shape_cast %29 : vector<2x16xf32> to vector<2x16x1xf32>
    %cst_26 = arith.constant dense<0.000000e+00> : vector<16x1xf32>
    %31 = vector.multi_reduction <add>, %30, %cst_26 [0] : vector<2x16x1xf32> to vector<16x1xf32>
    %32 = vector.shape_cast %31 : vector<16x1xf32> to vector<1x16x1xf32>
    %cst_27 = arith.constant 6.250000e-02 : f32
    %33 = vector.broadcast %cst_27 : f32 to vector<1x16x1xf32>
    %34 = arith.mulf %27, %33 : vector<1x16x1xf32>
    %cst_28 = arith.constant 6.250000e-02 : f32
    %35 = vector.broadcast %cst_28 : f32 to vector<1x16x1xf32>
    %36 = arith.mulf %32, %35 : vector<1x16x1xf32>
    %37 = arith.mulf %34, %34 : vector<1x16x1xf32>
    %38 = arith.subf %36, %37 : vector<1x16x1xf32>
    %cst_29 = arith.constant 0.000000e+00 : f32
    %39 = vector.broadcast %cst_29 : f32 to vector<1x16x1xf32>
    %40 = arith.maximumf %38, %39 : vector<1x16x1xf32>
    %cst_30 = arith.constant 9.99999974E-6 : f32
    %41 = vector.broadcast %cst_30 : f32 to vector<1x16x1xf32>
    %42 = arith.addf %40, %41 : vector<1x16x1xf32>
    %43 = math.rsqrt %42 : vector<1x16x1xf32>
    %44 = arith.mulf %11, %43 : vector<1x16x1xf32>
    %45 = arith.mulf %34, %44 : vector<1x16x1xf32>
    %46 = arith.subf %12, %45 : vector<1x16x1xf32>
    %47 = vector.broadcast %44 : vector<1x16x1xf32> to vector<2x16x128xf32>
    %48 = arith.mulf %23, %47 : vector<2x16x128xf32>
    %49 = vector.broadcast %46 : vector<1x16x1xf32> to vector<2x16x128xf32>
    %50 = arith.addf %48, %49 : vector<2x16x128xf32>
    %51 = vector.broadcast %13 : vector<1x1x128xf32> to vector<2x16x128xf32>
    %52 = arith.addf %50, %51 : vector<2x16x128xf32>
    %cst_31 = arith.constant dense<0xFF800000> : vector<2x16xf32>
    %53 = vector.multi_reduction <maximumf>, %52, %cst_31 [2] : vector<2x16x128xf32> to vector<2x16xf32>
    %54 = vector.shape_cast %53 : vector<2x16xf32> to vector<2x16x1xf32>
    %55 = vector.broadcast %54 : vector<2x16x1xf32> to vector<2x16x128xf32>
    %56 = arith.subf %52, %55 : vector<2x16x128xf32>
    %57 = math.exp %56 : vector<2x16x128xf32>
    %cst_32 = arith.constant dense<0.000000e+00> : vector<2x16xf32>
    %58 = vector.multi_reduction <add>, %57, %cst_32 [2] : vector<2x16x128xf32> to vector<2x16xf32>
    %59 = vector.shape_cast %58 : vector<2x16xf32> to vector<2x16x1xf32>
    %60 = vector.broadcast %59 : vector<2x16x1xf32> to vector<2x16x128xf32>
    %61 = arith.divf %57, %60 : vector<2x16x128xf32>
    %c0_33 = arith.constant 0 : index
    %c0_34 = arith.constant 0 : index
    %c0_35 = arith.constant 0 : index
    %62 = vector.load %arg8[%c0_33, %c0_34, %c0_35] : memref<2x16x128xf32, #tpu.memory_space<vmem>>, vector<2x16x128xf32>
    tpu.vector_store %arg8[%c0_33, %c0_34, %c0_35], %61 {strides = array<i32>} : memref<2x16x128xf32, #tpu.memory_space<vmem>>, vector<2x16x128xf32>,
    return
  }
  func.func @transform_0(%arg0: i32) -> (i32, i32, i32) {
    %c0_i32 = arith.constant 0 : i32
    %c0_i32_0 = arith.constant 0 : i32
    %c0_i32_1 = arith.constant 0 : i32
    %c0_i32_2 = arith.constant 0 : i32
    return %c0_i32, %c0_i32_0, %c0_i32_1 : i32, i32, i32
  }
  func.func @transform_1(%arg0: i32) -> (i32, i32, i32) {
    %c0_i32 = arith.constant 0 : i32
    %c0_i32_0 = arith.constant 0 : i32
    %c0_i32_1 = arith.constant 0 : i32
    return %c0_i32, %arg0, %c0_i32_0 : i32, i32, i32
  }
  func.func @transform_2(%arg0: i32) -> (i32, i32) {
    %c0_i32 = arith.constant 0 : i32
    %c0_i32_0 = arith.constant 0 : i32
    %c0_i32_1 = arith.constant 0 : i32
    return %c0_i32, %c0_i32_0 : i32, i32
  }
  func.func @transform_3(%arg0: i32) -> (i32, i32, i32) {
    %c0_i32 = arith.constant 0 : i32
    %c0_i32_0 = arith.constant 0 : i32
    %c0_i32_1 = arith.constant 0 : i32
    %c0_i32_2 = arith.constant 0 : i32
    return %c0_i32, %c0_i32_0, %c0_i32_1 : i32, i32, i32
  }
  func.func @transform_4(%arg0: i32) -> (i32, i32, i32) {
    %c0_i32 = arith.constant 0 : i32
    %c0_i32_0 = arith.constant 0 : i32
    %c0_i32_1 = arith.constant 0 : i32
    return %c0_i32, %arg0, %c0_i32_0 : i32, i32, i32
  }
  func.func @transform_5(%arg0: i32) -> (i32, i32, i32) {
    %c0_i32 = arith.constant 0 : i32
    %c0_i32_0 = arith.constant 0 : i32
    %c0_i32_1 = arith.constant 0 : i32
    return %c0_i32, %arg0, %c0_i32_0 : i32, i32, i32
  }
  func.func @transform_6(%arg0: i32) -> (i32, i32, i32) {
    %c0_i32 = arith.constant 0 : i32
    %c0_i32_0 = arith.constant 0 : i32
    %c0_i32_1 = arith.constant 0 : i32
    %c0_i32_2 = arith.constant 0 : i32
    return %c0_i32, %c0_i32_0, %c0_i32_1 : i32, i32, i32
  }
  func.func @transform_7(%arg0: i32) -> (i32, i32, i32) {
    %c0_i32 = arith.constant 0 : i32
    %c0_i32_0 = arith.constant 0 : i32
    %c0_i32_1 = arith.constant 0 : i32
    return %c0_i32, %arg0, %c0_i32_0 : i32, i32, i32
  }
}

</mosaic_0001>

<bundles_post_ra>
// kernel: tpu_custom_call.1
= control target key start
LH: loop header
LB: loop body
LE: loop exit
PB: predicated region body
PF: predicated region fallthrough
CT: control target
= control target key end

     0   :  { %12 = vsyncpa [#allocation3], 0  ;;  %s792_s0 = inlined_call_operand.vmem [shape: f32[2,16,32], index: 0, kind: input, shape index: {}]   ;;  %s793_s1 = inlined_call_operand.hbm [shape: bf16[2,16,16], index: 1, kind: input, shape index: {}]   ;;  %s794_s2 = inlined_call_operand.hbm [shape: f32[32,128], index: 2, kind: input, shape index: {}]   ;;  %s795_s3 = inlined_call_operand.vmem [shape: f32[1,1,128], index: 3, kind: input, shape index: {}]   ;;  %s796_s4 = inlined_call_operand.vmem [shape: f32[1,16,1], index: 4, kind: input, shape index: {}]   ;;  %s797_s5 = inlined_call_operand.vmem [shape: f32[1,16,1], index: 5, kind: input, shape index: {}]   ;;  %s798_s6 = inlined_call_operand.vmem [shape: f32[1,1,128], index: 6, kind: input, shape index: {}]   ;;  %s799_s7 = inlined_call_operand.hbm [shape: f32[2,16,128], index: 7, kind: output, shape index: {}]  }
   0x1   :  { %13 = vsyncpa [#allocation6], 0 }
   0x2   :  { %14 = vsyncpa [#allocation4], 0  ;;  %s683_s24 = smov [#allocation2]  }
   0x3   :  { %s22_s25 = sshll.u32 %s683_s24, 4  ;;  %s23_s25 = int_to_ptr.vmem [resolvable:$true] %s22_s25 }
   0x4   :  { %s625_s26 = scalar_lea.vmem %s23_s25, 256  ;;  %p630_p1 = scmp.lt.s32.totalorder %s23_s25, %s23_s25 }
   0x5   :  { %p626_p0 = scmp.ne.s32.totalorder %s23_s25, %s625_s26  ;;  %p631_p2 = scmp.lt.s32.totalorder %s625_s26, %s625_s26 }
   0x7   :  { %p632_p3 = por %p631_p2, %p630_p1 }
   0x9   :  { %p633_p4 = pnand %p632_p3, %p626_p0 }
   0xb   :  { %636 = shalt.err (!%p633_p4)
}
   0xc   :  { %s684_s27 = smov 64   ;;  %s685_s28 = smov 4  }
   0xd   :  { %28 = dma.hbm_to_vmem [thread:$0]  %s793_s1, 256, %s23_s25, [#allocation3], %s684_s27, %s684_s27, %s685_s28  }
   0xe   :  { %s686_s8 = smov [#allocation5]  }
   0xf   :  { %s34_s9 = sshll.u32 %s686_s8, 4  ;;  %s35_s9 = int_to_ptr.vmem [resolvable:$true] %s34_s9 }
  0x10   :  { %s645_s10 = scalar_lea.vmem %s35_s9, 512  ;;  %p650_p6 = scmp.lt.s32.totalorder %s35_s9, %s35_s9 }
  0x11   :  { %p646_p5 = scmp.ne.s32.totalorder %s35_s9, %s645_s10  ;;  %p651_p7 = scmp.lt.s32.totalorder %s645_s10, %s645_s10 }
  0x13   :  { %p652_p8 = por %p651_p7, %p650_p6 }
  0x15   :  { %p653_p9 = pnand %p652_p8, %p646_p5 }
  0x17   :  { %656 = shalt.err (!%p653_p9)
}
  0x18   :  { %s687_s11 = smov 128   ;;  %s688_s12 = smov 8  }
  0x19   :  { %40 = dma.hbm_to_vmem [thread:$0]  %s794_s2, 512, %s35_s9, [#allocation6], %s687_s11, %s687_s11, %s688_s12  }
  0x1a   :  { %677 = dma.done.wait [#allocation3], 256  }
  0x1b   :  { %678 = vsyncadd [#allocation3], 4294967040 }
  0x1c   :  { %679 = dma.done.wait [#allocation6], 512  }
  0x1d   :  { %680 = vsyncadd [#allocation6], 4294966784  ;;  %v64_v0 = vld [vmem:[%s792_s0 + $0x8] sm:$0xff]  ;;  %v63_v1 = vld [vmem:[%s792_s0] sm:$0xff]  ;;  %vm67_vm0 = vcmask 130048   ;;  %vm234_vm1 = vcmask 261120  }
  0x1e   :  { %v527_v2 = vld [vmem:[#allocation2] sm:$0xff]   ;;  %551 = vmatprep.subr.mxu1 %v64_v0  ;;  %v534_v5 = vld [vmem:[#allocation2 + $0x8] sm:$0xff]   ;;  %v66_v6 = vld [vmem:[%s792_s0 + $0x18] sm:$0xff]  ;;  %v689_v55 = vmov 0  }
  0x1f   :  { %v528_v3 = vunpack.c.l.bf16 %v527_v2  ;;  %v529_v4 = vunpack.c.h.bf16 %v527_v2  ;;  %552 = vmatpush3.msra.mxu1 %v64_v0  ;;  %v532_v7 = vunpack.c.l.bf16 %v534_v5  ;;  %v233_v8 = vld [vmem:[#allocation5 + $0x18] sm:$0xff]  ;;  %v65_v9 = vld [vmem:[%s792_s0 + $0x10] sm:$0xff]  ;;  %v533_v10 = vunpack.c.h.bf16 %v534_v5  ;;  %v232_v11 = vld [vmem:[#allocation5 + $0x10] sm:$0xff]  ;;  %587 = vset.pattern.permute.xlu0 %v689_v55 }
  0x20   :  { %553 = vmatprep.subr.mxu1 %v63_v1  ;;  %565 = vmatprep.subr.mxu0 %v233_v8  ;;  %v231_v12 = vld [vmem:[#allocation5 + $0x8] sm:$0xff]  ;;  %v230_v13 = vld [vmem:[#allocation5] sm:$0xff]  ;;  %v524_v19 = vld [vmem:[%s795_s3] ss:$0 sm:$0xff] }
  0x21   :  { %555 = vmatprep.mubr.msk.f32.mxu1 %vm67_vm0, %v528_v3  ;;  %554 = vmatpush3.msra.mxu1 %v63_v1 }
  0x22   :  { %556 = vmatmul.mubr.msk.f32.vlgmr.msra.gmra.mxu1 %vm67_vm0, %v529_v4  ;;  %558 = vmatprep.subr.mxu1 %v66_v6 }
  0x23   :  { %559 = vmatpush3.msra.mxu1 %v66_v6  ;;  %562 = vmatprep.mubr.msk.f32.mxu1 %vm67_vm0, %v532_v7 }
  0x24   :  { %560 = vmatprep.subr.mxu1 %v65_v9  ;;  %566 = vmatpush3.msra.mxu0 %v233_v8 }
  0x25   :  { %561 = vmatpush3.msra.mxu1 %v65_v9  ;;  %567 = vmatprep.subr.mxu0 %v232_v11 }
  0x26   :  { %563 = vmatmul.mubr.msk.f32.vlgmr.msra.gmra.mxu1 %vm67_vm0, %v533_v10  ;;  %568 = vmatpush3.msra.mxu0 %v232_v11 }
  0x27   :  { %569 = vmatprep.subr.mxu0 %v231_v12  ;;  %588 = vset.pattern.permute.xlu1 %v689_v55 }
  0x28   :  { %570 = vmatpush3.msra.mxu0 %v231_v12 }
  0x29   :  { %571 = vmatprep.subr.mxu0 %v230_v13 }
  0x2a   :  { %572 = vmatpush3.msra.mxu0 %v230_v13 }
  0xe2   :  { %v557_v14 = vpop.f32.mrf.mxu1 }
  0xe4   :  { %v140_v15 = vpop.f32.mrf.mxu1 }
  0xe5   :  { %573 = vmatprep.mubr.msk.f32.mxu0 %vm234_vm1, %v140_v15 }
  0xe6   :  { %v564_v16 = vpop.f32.mrf.mxu1  ;;  %574 = vmatmul.mubr.msk.f32.vlgmr.msra.gmra.mxu0 %vm234_vm1, %v557_v14 }
  0xe8   :  { %v221_v17 = vpop.f32.mrf.mxu1 }
  0xe9   :  { %576 = vmatprep.mubr.msk.f32.mxu0 %vm234_vm1, %v221_v17 }
  0xea   :  { %577 = vmatmul.mubr.msk.f32.gmra.mxu0 %vm234_vm1, %v564_v16  ;;  %v343_v16 = vld [vmem:[%s796_s4] sm:$0xff] }
 0x1a6   :  { %v575_v18 = vpop.f32.mrf.mxu0 }
 0x1a7   :  { %v340_v23 = vadd.f32 %v575_v18, %v524_v19 }
 0x1a8   :  { %v313_v20 = vpop.f32.mrf.mxu0 }
 0x1a9   :  { %v339_v21 = vadd.f32 %v524_v19, %v313_v20  ;;  %v349_v28 = vmul.f32 %v340_v23, %v340_v23 }
 0x1aa   :  { %v578_v22 = vpop.f32.mrf.mxu0 }
 0x1ab   :  { %v348_v24 = vmul.f32 %v339_v21, %v339_v21  ;;  %v342_v27 = vadd.f32 %v578_v22, %v524_v19 }
 0x1ac   :  { %v323_v25 = vpop.f32.mrf.mxu0 }
 0x1ad   :  { %v341_v26 = vadd.f32 %v524_v19, %v323_v25  ;;  %352 = vadd.xlane.f32.xlu0 %v348_v24  ;;  %v351_v30 = vmul.f32 %v342_v27, %v342_v27  ;;  %v344_v19 = vld [vmem:[%s796_s4 + $0x8] sm:$0xff] }
 0x1af   :  { %v350_v29 = vmul.f32 %v341_v26, %v341_v26 }
 0x1b1   :  { %354 = vadd.xlane.f32.xlu0 %v349_v28  ;;  %356 = vadd.xlane.f32.xlu1 %v350_v29 }
 0x1b5   :  { %358 = vadd.xlane.f32.xlu1 %v351_v30 }
 0x236   :  { %v353_v31 = vpop.xlane.xlu0 %352 }
 0x237   :  { %v360_v32 = vmax.f32 %v353_v31, 1e-24 }
 0x239   :  { %589 = vrsqrt.f32 %v360_v32  ;;  %v525_v32 = vld [vmem:[%s798_s6] ss:$0 sm:$0xff] }
 0x23a   :  { %v355_v33 = vpop.xlane.xlu0 %354  ;;  %v357_v34 = vpop.xlane.xlu1 %356 }
 0x23b   :  { %v361_v35 = vmax.f32 %v355_v33, 1e-24  ;;  %v362_v36 = vmax.f32 %v357_v34, 1e-24 }
 0x23d   :  { %591 = vrsqrt.f32 %v361_v35 }
 0x23e   :  { %593 = vrsqrt.f32 %v362_v36  ;;  %v359_v37 = vpop.xlane.xlu1 %358 }
 0x23f   :  { %v363_v38 = vmax.f32 %v359_v37, 1e-24 }
 0x241   :  { %595 = vrsqrt.f32 %v363_v38 }
 0x246   :  { %v590_v39 = vpop.eup %589 }
 0x247   :  { %v368_v40 = vmul.f32 %v590_v39, %v339_v21 }
 0x249   :  { %v759_v41 = vmax.f32 %v368_v40, 0.0 }
 0x24a   :  { %v592_v42 = vpop.eup %591 }
 0x24b   :  { %v594_v43 = vpop.eup %593  ;;  %376 = vadd.xlane.f32.xlu0 %v759_v41  ;;  %v369_v44 = vmul.f32 %v592_v42, %v340_v23  ;;  %v386_v45 = vmul.f32 %v759_v41, %v759_v41  ;;  %v345_v23 = vld [vmem:[%s797_s5] sm:$0xff] }
 0x24c   :  { %v370_v47 = vmul.f32 %v594_v43, %v341_v26  ;;  %v346_v26 = vld [vmem:[%s797_s5 + $0x8] sm:$0xff]  ;;  %s690_s5 = smov [#allocation7]  }
 0x24d   :  { %v764_v46 = vmax.f32 %v369_v44, 0.0  ;;  %s503_s6 = sshll.u32 %s690_s5, 4  ;;  %s504_s6 = int_to_ptr.vmem [resolvable:$true] %s503_s6 }
 0x24e   :  { %v596_v48 = vpop.eup %595  ;;  %v374_v50 = vmax.f32 %v370_v47, 0.0  ;;  %s657_s30 = scalar_lea.vmem %s504_s6, 512  ;;  %p662_p11 = scmp.lt.s32.totalorder %s504_s6, %s504_s6 }
 0x24f   :  { %390 = vadd.xlane.f32.xlu0 %v386_v45  ;;  %378 = vadd.xlane.f32.xlu1 %v764_v46  ;;  %v387_v49 = vmul.f32 %v764_v46, %v764_v46  ;;  %v371_v51 = vmul.f32 %v596_v48, %v342_v27  ;;  %p658_p10 = scmp.ne.s32.totalorder %s504_s6, %s657_s30  ;;  %p663_p12 = scmp.lt.s32.totalorder %s657_s30, %s657_s30 }
 0x250   :  { %v388_v52 = vmul.f32 %v374_v50, %v374_v50 }
 0x251   :  { %v375_v53 = vmax.f32 %v371_v51, 0.0  ;;  %p664_p13 = por %p663_p12, %p662_p11 }
 0x253   :  { %392 = vadd.xlane.f32.xlu1 %v387_v49  ;;  %380 = vadd.xlane.f32.xlu0 %v374_v50  ;;  %v389_v54 = vmul.f32 %v375_v53, %v375_v53  ;;  %p665_p0 = pnand %p664_p13, %p658_p10 }
 0x257   :  { %394 = vadd.xlane.f32.xlu0 %v388_v52  ;;  %382 = vadd.xlane.f32.xlu1 %v375_v53 }
 0x25b   :  { %396 = vadd.xlane.f32.xlu1 %v389_v54 }
 0x2d4   :  { %v377_v56 = vpop.xlane.xlu0 %376 }
 0x2d8   :  { %v391_v57 = vpop.xlane.xlu0 %390  ;;  %v379_v58 = vpop.xlane.xlu1 %378 }
 0x2dc   :  { %v381_v59 = vpop.xlane.xlu0 %380  ;;  %v393_v60 = vpop.xlane.xlu1 %392 }
 0x2dd   :  { %v384_v61 = vadd.f32 %v381_v59, %v377_v56 }
 0x2df   :  { %v400_v62 = vmul.f32 0.0625, %v384_v61 }
 0x2e0   :  { %v395_v63 = vpop.xlane.xlu0 %394  ;;  %v383_v0 = vpop.xlane.xlu1 %382 }
 0x2e1   :  { %v398_v1 = vadd.f32 %v395_v63, %v391_v57  ;;  %v385_v2 = vadd.f32 %v383_v0, %v379_v58  ;;  %v404_v3 = vmul.f32 %v400_v62, %v400_v62 }
 0x2e3   :  { %v402_v4 = vmul.f32 0.0625, %v398_v1  ;;  %v401_v5 = vmul.f32 0.0625, %v385_v2 }
 0x2e4   :  { %v397_v6 = vpop.xlane.xlu1 %396 }
 0x2e5   :  { %v406_v7 = vsub.f32 %v402_v4, %v404_v3  ;;  %v399_v8 = vadd.f32 %v397_v6, %v393_v60  ;;  %v405_v10 = vmul.f32 %v401_v5, %v401_v5 }
 0x2e7   :  { %v408_v9 = vmax.f32 %v406_v7, 0.0  ;;  %v403_v11 = vmul.f32 0.0625, %v399_v8 }
 0x2e9   :  { %v410_v12 = vadd.f32 1e-05, %v408_v9  ;;  %v407_v13 = vsub.f32 %v403_v11, %v405_v10 }
 0x2eb   :  { %597 = vrsqrt.f32 %v410_v12  ;;  %v409_v14 = vmax.f32 %v407_v13, 0.0 }
 0x2ed   :  { %v411_v15 = vadd.f32 1e-05, %v409_v14 }
 0x2ef   :  { %599 = vrsqrt.f32 %v411_v15 }
 0x2f8   :  { %v598_v17 = vpop.eup %597 }
 0x2f9   :  { %v414_v18 = vmul.f32 %v598_v17, %v343_v16 }
 0x2fb   :  { %422 = vperm.xlu0 %587, %v414_v18   ;;  %v416_v22 = vmul.f32 %v414_v18, %v400_v62 }
 0x2fc   :  { %v600_v20 = vpop.eup %599 }
 0x2fd   :  { %v415_v21 = vmul.f32 %v600_v20, %v344_v19  ;;  %v418_v24 = vsub.f32 %v345_v23, %v416_v22 }
 0x2ff   :  { %427 = vperm.xlu1 %588, %v415_v21   ;;  %v417_v25 = vmul.f32 %v415_v21, %v401_v5 }
 0x301   :  { %v419_v27 = vsub.f32 %v346_v26, %v417_v25 }
 0x303   :  { %436 = vperm.xlu1 %588, %v418_v24  }
 0x307   :  { %441 = vperm.xlu1 %588, %v419_v27  }
 0x376   :  { %v423_v28 = vpop.permute.xlu0 %422 }
 0x377   :  { %v430_v30 = vmul.f32 %v423_v28, %v759_v41  ;;  %v432_v33 = vmul.f32 %v423_v28, %v374_v50 }
 0x37a   :  { %v428_v29 = vpop.permute.xlu1 %427 }
 0x37b   :  { %v431_v35 = vmul.f32 %v428_v29, %v764_v46  ;;  %v433_v39 = vmul.f32 %v428_v29, %v375_v53 }
 0x37e   :  { %v437_v31 = vpop.permute.xlu1 %436 }
 0x37f   :  { %v444_v34 = vadd.f32 %v437_v31, %v430_v30  ;;  %v446_v36 = vadd.f32 %v437_v31, %v432_v33 }
 0x381   :  { %v454_v37 = vadd.f32 %v525_v32, %v444_v34  ;;  %v456_v43 = vadd.f32 %v525_v32, %v446_v36 }
 0x382   :  { %v442_v38 = vpop.permute.xlu1 %441 }
 0x383   :  { %v445_v40 = vadd.f32 %v442_v38, %v431_v35  ;;  %458 = vmax.xlane.f32.xlu1 %v454_v37  ;;  %v447_v42 = vadd.f32 %v442_v38, %v433_v39 }
 0x385   :  { %v455_v44 = vadd.f32 %v525_v32, %v445_v40  ;;  %v457_v41 = vadd.f32 %v525_v32, %v447_v42 }
 0x387   :  { %462 = vmax.xlane.f32.xlu1 %v456_v43  ;;  %460 = vmax.xlane.f32.xlu0 %v455_v44 }
 0x38b   :  { %464 = vmax.xlane.f32.xlu1 %v457_v41 }
 0x40c   :  { %v459_v45 = vpop.xlane.xlu1 %458 }
 0x40d   :  { %v466_v49 = vsub.f32 %v454_v37, %v459_v45 }
 0x40f   :  { %v470_v55 = vmul.f32 1.442695, %v466_v49 }
 0x410   :  { %v461_v47 = vpop.xlane.xlu0 %460  ;;  %v463_v48 = vpop.xlane.xlu1 %462 }
 0x411   :  { %v467_v50 = vsub.f32 %v455_v44, %v461_v47  ;;  %v468_v51 = vsub.f32 %v456_v43, %v463_v48 }
 0x413   :  { %v472_v46 = vmul.f32 1.442695, %v467_v50  ;;  %v474_v52 = vmul.f32 1.442695, %v468_v51 }
 0x414   :  { %v465_v54 = vpop.xlane.xlu1 %464 }
 0x415   :  { %601 = vpow2.f32 %v472_v46  ;;  %v469_v53 = vsub.f32 %v457_v41, %v465_v54 }
 0x416   :  { %603 = vpow2.f32 %v474_v52 }
 0x417   :  { %605 = vpow2.f32 %v470_v55  ;;  %v476_v56 = vmul.f32 1.442695, %v469_v53 }
 0x419   :  { %607 = vpow2.f32 %v476_v56 }
 0x422   :  { %v602_v57 = vpop.eup %601 }
 0x423   :  { %v604_v58 = vpop.eup %603  ;;  %480 = vadd.xlane.f32.xlu1 %v602_v57 }
 0x424   :  { %482 = vadd.xlane.f32.xlu0 %v604_v58  ;;  %v606_v59 = vpop.eup %605 }
 0x426   :  { %v608_v60 = vpop.eup %607 }
 0x427   :  { %478 = vadd.xlane.f32.xlu1 %v606_v59 }
 0x42b   :  { %484 = vadd.xlane.f32.xlu1 %v608_v60 }
 0x4ac   :  { %v481_v61 = vpop.xlane.xlu1 %480 }
 0x4ad   :  { %v483_v62 = vpop.xlane.xlu0 %482  ;;  %609 = vrcp.f32 %v481_v61 }
 0x4ae   :  { %611 = vrcp.f32 %v483_v62 }
 0x4b0   :  { %v479_v63 = vpop.xlane.xlu1 %478 }
 0x4b1   :  { %613 = vrcp.f32 %v479_v63 }
 0x4b4   :  { %v485_v0 = vpop.xlane.xlu1 %484 }
 0x4b5   :  { %615 = vrcp.f32 %v485_v0 }
 0x4ba   :  { %v610_v1 = vpop.eup %609 }
 0x4bb   :  { %v612_v2 = vpop.eup %611  ;;  %v489_v3 = vmul.f32 %v610_v1, %v602_v57 }
 0x4bc   :  { %v491_v4 = vmul.f32 %v612_v2, %v604_v58 }
 0x4bd   :  { %495 = vst [vmem:[#allocation7 + $0x8] sm:$0xff] %v489_v3 }
 0x4be   :  { %v614_v5 = vpop.eup %613  ;;  %496 = vst [vmem:[#allocation7 + $0x10] sm:$0xff] %v491_v4 }
 0x4bf   :  { %v487_v6 = vmul.f32 %v614_v5, %v606_v59 }
 0x4c1   :  { %494 = vst [vmem:[#allocation7] sm:$0xff] %v487_v6 }
 0x4c2   :  { %v616_v7 = vpop.eup %615 }
 0x4c3   :  { %v493_v8 = vmul.f32 %v616_v7, %v608_v60 }
 0x4c5   :  { %497 = vst [vmem:[#allocation7 + $0x18] sm:$0xff] %v493_v8 }
 0x4c6   :  { %668 = shalt.err (!%p665_p0)
}
 0x4c7   :  { %509 = dma.vmem_to_hbm [thread:$0]  %s504_s6, 512, %s799_s7, [#allocation4], %s687_s11, %s687_s11, %s688_s12  }
 0x4c8   :  { %681 = dma.done.wait [#allocation4], 512  }
 0x4c9   :  { %682 = vsyncadd [#allocation4], 4294966784 }
 0x4ca   :  { %513 = vsyncpa [#allocation3], 1 }
 0x4cb   :  { %514 = vsyncpa [#allocation6], 1 }
 0x4cc   :  { %515 = vsyncpa [#allocation4], 1 }

</bundles_post_ra>
